<compile_context>
chip_gen: v5e
topology: v5e:2x2
jax: 0.10.0
libtpu: 0.0.40
codegen_flags: <defaults>
</compile_context>

<pallas_src>
import jax
import jax.numpy as jnp
from jax import lax
from jax.experimental import pallas as pl
from jax.experimental.pallas import tpu as pltpu

KSIZE = 5
PAD = KSIZE - 1          # causal padding = kernel_size - 1
BN_EPS = 1e-5
LANE = 128


def _rup(n, m=LANE):
    return ((n + m - 1) // m) * m


# ---------------------------------------------------------------------------
# Prologue kernel: image_linear + BatchNorm1d (training-mode batch stats).
# Tiny ((B, F) -> (B, E)), runs once, gridless, all f32 (BN math stays f32).
# ---------------------------------------------------------------------------
def bn_prologue_kernel(feat_ref, w_img_ref, b_img_ref, gamma_ref, beta_ref,
                       out_ref):
    f = jnp.dot(feat_ref[...], w_img_ref[...],
                preferred_element_type=jnp.float32) + b_img_ref[...]
    mu = jnp.mean(f, axis=0, keepdims=True)
    var = jnp.mean((f - mu) ** 2, axis=0, keepdims=True)     # biased, as torch
    out_ref[...] = (f - mu) * lax.rsqrt(var + BN_EPS) * gamma_ref[...] \
        + beta_ref[...]


# ---------------------------------------------------------------------------
# Main kernel: one batch element per grid step.
#   caps_ref     (B*T,) int32  scalar-prefetch ids (SMEM)
#   bnf_ref      (1, 1, E) f32 BN'd image feature for batch b
#   emb_hbm_ref  (V, E)  f32   embedding table, stays in HBM (pl.ANY)
#   w_conv_ref   (K, E, H)     conv weight, tap-major (matmul dtype)
#   out_ref      (1, T, Vp)    lane-dense padded logits for batch b
#   xp_ref       (PAD+1+T, E)  f32 VMEM scratch: [zeros(PAD), bn_feat, emb(T)]
#   sem          (T,) DMA semaphores
# ---------------------------------------------------------------------------
def caption_kernel(caps_ref, bnf_ref, emb_hbm_ref,
                   w_conv_ref, b_conv_ref, w1_ref, b1_ref, w2_ref, b2_ref,
                   out_ref, xp_ref, sem):
    b = pl.program_id(0)
    T = out_ref.shape[1]
    E = xp_ref.shape[1]
    H = b_conv_ref.shape[1]
    vocab = emb_hbm_ref.shape[0]

    # ---- data-dependent row gather: HBM emb table -> xp rows PAD+1.. -------
    copies = []
    for t in range(T):
        idx = caps_ref[b * T + t]
        idx = jnp.clip(idx, 0, vocab - 1)   # OOB ids clamped (torch would raise)
        cp = pltpu.make_async_copy(
            emb_hbm_ref.at[pl.ds(idx, 1), :],
            xp_ref.at[pl.ds(PAD + 1 + t, 1), :],
            sem.at[t])
        cp.start()
        copies.append(cp)

    # ---- causal zero padding + BN'd image feature at sequence position 0 ---
    xp_ref[pl.ds(0, PAD), :] = jnp.zeros((PAD, E), xp_ref.dtype)
    xp_ref[pl.ds(PAD, 1), :] = bnf_ref[...].reshape(1, E).astype(xp_ref.dtype)

    for cp in copies:
        cp.wait()

    # ---- causal conv: out[t] = sum_k xp[t+k] @ w_conv[k]  (f32 accumulate) -
    acc = jnp.zeros((T, H), jnp.float32)
    for k in range(KSIZE):
        tap = xp_ref[pl.ds(k, T), :].astype(w_conv_ref.dtype)      # (T, E)
        acc = acc + jnp.dot(tap, w_conv_ref[k],
                            preferred_element_type=jnp.float32)
    h = jnp.maximum(acc + b_conv_ref[...], 0.0)                    # (T, H) f32

    # ---- fc1 -> relu -> fc2 (vocab padded to lane-dense Vp) ----------------
    h1 = jnp.maximum(
        jnp.dot(h.astype(w1_ref.dtype), w1_ref[...],
                preferred_element_type=jnp.float32) + b1_ref[...], 0.0)
    y = jnp.dot(h1.astype(w2_ref.dtype), w2_ref[...],
                preferred_element_type=jnp.float32) + b2_ref[...]  # (T, Vp)
    out_ref[...] = y.reshape(1, T, y.shape[-1])


# ---------------------------------------------------------------------------
# Wrapper / parameter preparation
# ---------------------------------------------------------------------------
def prepare_params(params, matmul_dtype=jnp.bfloat16):
    """Cast matmul weights to `matmul_dtype`; pad only the vocab lane dim."""
    V = params["w2"].shape[1]
    Vp = _rup(V)
    f32 = jnp.float32
    return {
        # emb table stays f32: its rows are DMA-gathered into the f32 scratch.
        "emb_table": params["emb_table"].astype(f32),
        "w_img":     params["w_img"].astype(f32),
        "b_img":     params["b_img"].astype(f32),
        "gamma":     params["gamma"].astype(f32),
        "beta":      params["beta"].astype(f32),
        "w_conv":    params["w_conv"].astype(matmul_dtype),
        "b_conv":    params["b_conv"].astype(f32),
        "w1":        params["w1"].astype(matmul_dtype),
        "b1":        params["b1"].astype(f32),
        "w2":        jnp.pad(params["w2"],
                             ((0, 0), (0, Vp - V))).astype(matmul_dtype),
        "b2":        jnp.pad(params["b2"], ((0, 0), (0, Vp - V))).astype(f32),
        "vocab_size": V,
    }


def caption_forward(features, captions, lengths, p):
    # `lengths` accepted for signature fidelity; unused (as in torch forward).
    del lengths
    B, T = captions.shape
    V = p["vocab_size"]
    K, E, H = p["w_conv"].shape
    M, Vp = p["w2"].shape
    # BatchNorm uses training-mode batch statistics -> needs B >= 2.
    assert B > 1, "BatchNorm1d batch statistics require batch size >= 2"

    vmem = pl.BlockSpec(memory_space=pltpu.MemorySpace.VMEM)

    # ---- prologue: image_linear + BN (stats over the whole batch) ----------
    bn_feat = pl.pallas_call(
        bn_prologue_kernel,
        out_shape=jax.ShapeDtypeStruct((B, E), jnp.float32),
        in_specs=[vmem] * 5,
        out_specs=vmem,
    )(features.astype(jnp.float32), p["w_img"], p["b_img"],
      p["gamma"], p["beta"])
    bn_feat3 = bn_feat.reshape(B, 1, E)

    # ---- VMEM budget (resident weights + scratch + double-buffered out) ----
    def nbytes(a):
        return int(a.size) * a.dtype.itemsize
    resident = (sum(nbytes(p[k]) for k in
                    ("w_conv", "b_conv", "w1", "b1", "w2", "b2"))
                + B * E * 4                       # bn_feat
                + (PAD + 1 + T) * E * 4           # sequence scratch
                + 2 * T * Vp * 4)                 # double-buffered out block
    vmem_limit = int(min(64 * 2**20, max(32 * 2**20, 4 * resident)))

    inv2 = lambda b, caps: (0, 0)                 # grid-invariant 2-D block
    inv3 = lambda b, caps: (0, 0, 0)
    grid_spec = pltpu.PrefetchScalarGridSpec(
        num_scalar_prefetch=1,                    # caption ids -> SMEM
        grid=(B,),
        in_specs=[
            pl.BlockSpec((1, 1, E), lambda b, caps: (b, 0, 0)),  # bn feature
            pl.BlockSpec(memory_space=pl.ANY),                   # emb table HBM
            pl.BlockSpec((K, E, H), inv3),                       # w_conv
            pl.BlockSpec((1, H), inv2),                          # b_conv
            pl.BlockSpec((H, M), inv2),                          # w1
            pl.BlockSpec((1, M), inv2),                          # b1
            pl.BlockSpec((M, Vp), inv2),                         # w2
            pl.BlockSpec((1, Vp), inv2),                         # b2
        ],
        out_specs=pl.BlockSpec((1, T, Vp), lambda b, caps: (b, 0, 0)),
        scratch_shapes=[
            pltpu.VMEM((PAD + 1 + T, E), jnp.float32),
            pltpu.SemaphoreType.DMA((T,)),
        ],
    )
    out = pl.pallas_call(
        caption_kernel,
        out_shape=jax.ShapeDtypeStruct((B, T, Vp), jnp.float32),
        grid_spec=grid_spec,
        compiler_params=pltpu.CompilerParams(
            dimension_semantics=("parallel",),     # v7x megacore sharding
            vmem_limit_bytes=vmem_limit,
        ),
    )(captions.astype(jnp.int32).reshape(B * T), bn_feat3, p["emb_table"],
      p["w_conv"], p["b_conv"], p["w1"], p["b1"], p["w2"], p["b2"])

    # At realistic vocab keep the Vp-padded lane-dense logits and mask
    # downstream; the slice here is only for shape fidelity with the module.
    return out[:, :, :V]


def reference_forward(features, captions, params):
    """Pure-JAX f32 reference following the PyTorch forward literally."""
    f = features @ params["w_img"] + params["b_img"]
    mu = f.mean(0, keepdims=True)
    var = ((f - mu) ** 2).mean(0, keepdims=True)
    f = (f - mu) / jnp.sqrt(var + BN_EPS) * params["gamma"] + params["beta"]
    emb = params["emb_table"][captions]
    x = jnp.concatenate([f[:, None, :], emb], axis=1)          # (B, T+1, E)
    xc = jnp.transpose(x, (0, 2, 1))                           # NCW
    w = jnp.transpose(params["w_conv"], (2, 1, 0))             # (H, E, K)
    y = lax.conv_general_dilated(xc, w, window_strides=(1,),
                                 padding=[(PAD, PAD)],
                                 dimension_numbers=("NCH", "OIH", "NCH"))
    y = y + params["b_conv"][0][None, :, None]
    y = jax.nn.relu(y)
    y = jnp.transpose(y, (0, 2, 1))[:, :-PAD, :]               # (B, T+1, H)
    h1 = jax.nn.relu(y @ params["w1"] + params["b1"])
    out = h1 @ params["w2"] + params["b2"]
    return out[:, :-1, :]


if __name__ == "__main__":
    # small shapes implied by the module
    B, T = 2, 8
    feature_size, embed_size, hidden_size, vocab_size = 12, 32, 32, 40

    key = jax.random.PRNGKey(0)
    ks = jax.random.split(key, 16)

    params = {
        "emb_table": jax.random.normal(ks[0], (vocab_size, embed_size), jnp.float32) * 0.1,
        "w_img":  jax.random.normal(ks[1], (feature_size, embed_size), jnp.float32) * 0.1,
        "b_img":  jax.random.normal(ks[2], (1, embed_size), jnp.float32) * 0.1,
        "gamma":  1.0 + 0.1 * jax.random.normal(ks[3], (1, embed_size), jnp.float32),
        "beta":   0.1 * jax.random.normal(ks[4], (1, embed_size), jnp.float32),
        "w_conv": jax.random.normal(ks[5], (KSIZE, embed_size, hidden_size), jnp.float32) * 0.1,
        "b_conv": jax.random.normal(ks[6], (1, hidden_size), jnp.float32) * 0.1,
        "w1":     jax.random.normal(ks[7], (hidden_size, 64), jnp.float32) * 0.1,
        "b1":     jax.random.normal(ks[8], (1, 64), jnp.float32) * 0.1,
        "w2":     jax.random.normal(ks[9], (64, vocab_size), jnp.float32) * 0.1,
        "b2":     jax.random.normal(ks[10], (1, vocab_size), jnp.float32) * 0.1,
    }

    features = jax.random.normal(ks[11], (B, feature_size), jnp.float32)
    captions = jax.random.randint(ks[12], (B, T), 0, vocab_size, jnp.int32)
    lengths = jnp.full((B,), T, jnp.int32)   # unused by forward (as in torch)

    ref = reference_forward(features, captions, params)

    # f32 variant: numerically faithful, tight tolerance.
    p32 = prepare_params(params, matmul_dtype=jnp.float32)
    out32 = jax.block_until_ready(caption_forward(features, captions, lengths, p32))
    assert out32.shape == (B, T, vocab_size), out32.shape
    assert jnp.allclose(out32, ref, atol=1e-3, rtol=1e-3), \
        float(jnp.max(jnp.abs(out32 - ref)))

    # bf16-weight variant: MXU-friendly, looser tolerance vs the f32 reference.
    pbf = prepare_params(params, matmul_dtype=jnp.bfloat16)
    outbf = jax.block_until_ready(caption_forward(features, captions, lengths, pbf))
    assert outbf.shape == (B, T, vocab_size), outbf.shape
    assert jnp.allclose(outbf, ref, atol=5e-2, rtol=5e-2), \
        float(jnp.max(jnp.abs(outbf - ref)))

    # TODO(synk): sample()/incremental_forward (greedy decode with the
    # AdvancedConv1d incremental buffer) is an inference-only path and is not
    # part of forward(); it is not implemented here.
    print("KERNEL_OK")
</pallas_src>

<mosaic_0001>
module attributes {stable_mosaic.version = 11 : i64} {
  func.func @bn_prologue_kernel(%arg0: memref<2x12xf32, #tpu.memory_space<vmem>>, %arg1: memref<12x32xf32, #tpu.memory_space<vmem>>, %arg2: memref<1x32xf32, #tpu.memory_space<vmem>>, %arg3: memref<1x32xf32, #tpu.memory_space<vmem>>, %arg4: memref<1x32xf32, #tpu.memory_space<vmem>>, %arg5: memref<2x32xf32, #tpu.memory_space<vmem>>) attributes {dimension_semantics = [], scalar_prefetch = 0 : i64, scratch_operands = 0 : i64, tpu.core_type = #tpu.core_type<tc>} {
    %c0 = arith.constant 0 : index
    %c0_0 = arith.constant 0 : index
    %0 = vector.load %arg0[%c0, %c0_0] : memref<2x12xf32, #tpu.memory_space<vmem>>, vector<2x12xf32>
    %c0_1 = arith.constant 0 : index
    %c0_2 = arith.constant 0 : index
    %1 = vector.load %arg1[%c0_1, %c0_2] : memref<12x32xf32, #tpu.memory_space<vmem>>, vector<12x32xf32>
    %cst = arith.constant dense<0.000000e+00> : vector<2x32xf32>
    %2 = tpu.matmul %0, %1, %cst {dimension_numbers = #tpu.dot_dimension_numbers<[1], [0], [0], [1], [0, 0, 1, 1], [], []>} : vector<2x12xf32>, vector<12x32xf32>, vector<2x32xf32> -> vector<2x32xf32>
    %c0_3 = arith.constant 0 : index
    %c0_4 = arith.constant 0 : index
    %3 = vector.load %arg2[%c0_3, %c0_4] : memref<1x32xf32, #tpu.memory_space<vmem>>, vector<1x32xf32>
    %4 = vector.broadcast %3 : vector<1x32xf32> to vector<2x32xf32>
    %5 = arith.addf %2, %4 : vector<2x32xf32>
    %cst_5 = arith.constant dense<0.000000e+00> : vector<32xf32>
    %6 = vector.multi_reduction <add>, %5, %cst_5 [0] : vector<2x32xf32> to vector<32xf32>
    %7 = vector.shape_cast %6 : vector<32xf32> to vector<1x32xf32>
    %cst_6 = arith.constant 2.000000e+00 : f32
    %8 = vector.broadcast %cst_6 : f32 to vector<1x32xf32>
    %9 = arith.divf %7, %8 : vector<1x32xf32>
    %10 = vector.broadcast %9 : vector<1x32xf32> to vector<2x32xf32>
    %11 = arith.subf %5, %10 : vector<2x32xf32>
    %12 = arith.mulf %11, %11 : vector<2x32xf32>
    %cst_7 = arith.constant dense<0.000000e+00> : vector<32xf32>
    %13 = vector.multi_reduction <add>, %12, %cst_7 [0] : vector<2x32xf32> to vector<32xf32>
    %14 = vector.shape_cast %13 : vector<32xf32> to vector<1x32xf32>
    %cst_8 = arith.constant 2.000000e+00 : f32
    %15 = vector.broadcast %cst_8 : f32 to vector<1x32xf32>
    %16 = arith.divf %14, %15 : vector<1x32xf32>
    %17 = vector.broadcast %9 : vector<1x32xf32> to vector<2x32xf32>
    %18 = arith.subf %5, %17 : vector<2x32xf32>
    %cst_9 = arith.constant 9.99999974E-6 : f32
    %19 = vector.broadcast %cst_9 : f32 to vector<1x32xf32>
    %20 = arith.addf %16, %19 : vector<1x32xf32>
    %21 = math.rsqrt %20 : vector<1x32xf32>
    %22 = vector.broadcast %21 : vector<1x32xf32> to vector<2x32xf32>
    %23 = arith.mulf %18, %22 : vector<2x32xf32>
    %c0_10 = arith.constant 0 : index
    %c0_11 = arith.constant 0 : index
    %24 = vector.load %arg3[%c0_10, %c0_11] : memref<1x32xf32, #tpu.memory_space<vmem>>, vector<1x32xf32>
    %25 = vector.broadcast %24 : vector<1x32xf32> to vector<2x32xf32>
    %26 = arith.mulf %23, %25 : vector<2x32xf32>
    %c0_12 = arith.constant 0 : index
    %c0_13 = arith.constant 0 : index
    %27 = vector.load %arg4[%c0_12, %c0_13] : memref<1x32xf32, #tpu.memory_space<vmem>>, vector<1x32xf32>
    %28 = vector.broadcast %27 : vector<1x32xf32> to vector<2x32xf32>
    %29 = arith.addf %26, %28 : vector<2x32xf32>
    %c0_14 = arith.constant 0 : index
    %c0_15 = arith.constant 0 : index
    %30 = vector.load %arg5[%c0_14, %c0_15] : memref<2x32xf32, #tpu.memory_space<vmem>>, vector<2x32xf32>
    tpu.vector_store %arg5[%c0_14, %c0_15], %29 {strides = array<i32>} : memref<2x32xf32, #tpu.memory_space<vmem>>, vector<2x32xf32>,
    return
  }
}

</mosaic_0001>

<bundles_post_ra>
// kernel: tpu_custom_call.1
= control target key start
LH: loop header
LB: loop body
LE: loop exit
PB: predicated region body
PF: predicated region fallthrough
CT: control target
= control target key end

     0   :  { %10 = vsyncpa [#allocation3], 0  ;;  %s303_s0 = inlined_call_operand.hbm [shape: f32[2,12], index: 0, kind: input, shape index: {}]   ;;  %s304_s1 = inlined_call_operand.hbm [shape: f32[12,32], index: 1, kind: input, shape index: {}]   ;;  %s305_s2 = inlined_call_operand.vmem [shape: f32[1,32], index: 2, kind: input, shape index: {}]   ;;  %s306_s3 = inlined_call_operand.vmem [shape: f32[1,32], index: 3, kind: input, shape index: {}]   ;;  %s307_s4 = inlined_call_operand.vmem [shape: f32[1,32], index: 4, kind: input, shape index: {}]   ;;  %s308_s5 = inlined_call_operand.hbm [shape: f32[2,32], index: 5, kind: output, shape index: {}]  }
   0x1   :  { %11 = vsyncpa [#allocation6], 0 }
   0x2   :  { %12 = vsyncpa [#allocation4], 0  ;;  %s18_s20 = sshll.u32 %s303_s0, 4  ;;  %s246_s21 = smov [#allocation2]   ;;  %s19_s20 = int_to_ptr.hbm [resolvable:$true] %s18_s20 }
   0x3   :  { %s20_s22 = sshll.u32 %s246_s21, 4  ;;  %s28_s25 = sshll.u32 %s304_s1, 4  ;;  %s21_s22 = int_to_ptr.vmem [resolvable:$true] %s20_s22  ;;  %s29_s25 = int_to_ptr.hbm [resolvable:$true] %s28_s25 }
   0x4   :  { %23 = dma.hbm_to_vmem [thread:$0]  %s19_s20, 32, %s21_s22, [#allocation3]  }
   0x5   :  { %s247_s26 = smov [#allocation5]   ;;  %s248_s28 = smov 128  }
   0x6   :  { %s30_s27 = sshll.u32 %s247_s26, 4  ;;  %s249_s29 = smov 8   ;;  %s31_s27 = int_to_ptr.vmem [resolvable:$true] %s30_s27 }
   0x7   :  { %36 = dma.hbm_to_vmem [thread:$0]  %s29_s25, 256, %s31_s27, [#allocation6], %s248_s28, %s248_s28, %s249_s29  }
   0x8   :  { %240 = dma.done.wait [#allocation3], 32  }
   0x9   :  { %241 = vsyncadd [#allocation3], 4294967264 }
   0xa   :  { %242 = dma.done.wait [#allocation6], 256  }
   0xb   :  { %243 = vsyncadd [#allocation6], 4294967040  ;;  %vm62_vm0 = vcmask 1043456   ;;  %v53_v0 = vld [vmem:[#allocation5 + $0x8] sm:$0xf]  ;;  %v52_v1 = vld [vmem:[#allocation5] sm:$0xff] }
   0xc   :  { %vm58_vm1 = vcmask 97280   ;;  %153 = vmatpush.msk.msra.mxu0 %vm62_vm0, %v53_v0  ;;  %v51_v2 = vld [vmem:[#allocation2] sm:$0x3]  ;;  %v250_v3 = vmov 2.0   ;;  %vm86_vm2 = vcmask 254976   ;;  %s251_s8 = smov [#allocation7]  }
   0xd   :  { %164 = vrcp.f32 %v250_v3  ;;  %v161_v5 = vld [vmem:[%s305_s2] ss:$0 sm:$0xff]  ;;  %s140_s9 = sshll.u32 %s251_s8, 4  ;;  %s142_s12 = sshll.u32 %s308_s5, 4  ;;  %s141_s9 = int_to_ptr.vmem [resolvable:$true] %s140_s9  ;;  %s143_s12 = int_to_ptr.hbm [resolvable:$true] %s142_s12 }
   0xe   :  { %81 = vmatpush.msra.mxu0 %v52_v1  ;;  %v162_v38 = vld [vmem:[%s306_s3] ss:$0 sm:$0xff] }
   0xf   :  { %154 = vmatmul.msk.f32.vlgmr.msra.gmra.mxu0 %vm58_vm1, %v51_v2  ;;  %v163_v41 = vld [vmem:[%s307_s4] ss:$0 sm:$0xff] }
  0x13   :  { %v165_v4 = vpop.eup %164 }
  0x14   :  { %v95_v6 = vmul.f32 2.0, %v165_v4  ;;  %vm99_vm3 = vweird.f32 %v165_v4 }
  0x16   :  { %v96_v9 = vsub.f32 1.0, %v95_v6 }
  0x18   :  { %v97_v12 = vmul.f32 %v165_v4, %v96_v9 }
  0x1a   :  { %v98_v15 = vadd.f32 %v165_v4, %v97_v12 }
  0x1c   :  { %v100_v18 = vsel %vm99_vm3, %v165_v4, %v98_v15 }
  0x8c   :  { %v83_v7 = vpop.f32.mrf.mxu0 }
  0x8d   :  { %v84_v8 = vadd.f32 %v161_v5, %v83_v7 }
  0x8f   :  { %v87_v10 = vsel %vm86_vm2, %v84_v8, 0.0 }
  0x90   :  { %v88_v11 = vrot.slane %v87_v10, 4 }
  0x92   :  { %v89_v13 = vadd.f32 %v88_v11, %v87_v10 }
  0x94   :  { %v90_v14 = vrot.slane %v89_v13, 2 }
  0x96   :  { %v91_v16 = vadd.f32 %v90_v14, %v89_v13 }
  0x98   :  { %v92_v17 = vrot.slane %v91_v16, 1 }
  0x9a   :  { %v93_v19 = vadd.f32 %v92_v17, %v91_v16 }
  0x9c   :  { %v101_v20 = vmul.f32 %v100_v18, %v93_v19 }
  0x9e   :  { %v102_v21 = vsub.f32 %v84_v8, %v101_v20 }
  0xa0   :  { %v103_v22 = vmul.f32 %v102_v21, %v102_v21 }
  0xa2   :  { %v104_v23 = vsel %vm86_vm2, %v103_v22, 0.0 }
  0xa3   :  { %v105_v24 = vrot.slane %v104_v23, 4 }
  0xa5   :  { %v106_v25 = vadd.f32 %v105_v24, %v104_v23 }
  0xa7   :  { %v107_v26 = vrot.slane %v106_v25, 2 }
  0xa9   :  { %v108_v27 = vadd.f32 %v107_v26, %v106_v25 }
  0xab   :  { %v109_v28 = vrot.slane %v108_v27, 1 }
  0xad   :  { %v110_v29 = vadd.f32 %v109_v28, %v108_v27 }
  0xaf   :  { %v111_v30 = vmul.f32 %v110_v29, %v100_v18 }
  0xb1   :  { %v112_v31 = vadd.f32 1e-05, %v111_v30 }
  0xb3   :  { %166 = vrsqrt.f32 %v112_v31  ;;  %vm119_vm5 = vweird.f32 %v112_v31 }
  0xb9   :  { %v167_v32 = vpop.eup %166 }
  0xba   :  { %v114_v33 = vmul.f32 %v167_v32, %v112_v31  ;;  %vm120_vm4 = vweird.f32 %v167_v32 }
  0xbb   :  { %vm121_vm6 = vmor %vm119_vm5, %vm120_vm4 }
  0xbc   :  { %v115_v34 = vmul.f32 %v167_v32, %v114_v33 }
  0xbe   :  { %v116_v35 = vmul.f32 0.5, %v115_v34 }
  0xc0   :  { %v117_v36 = vsub.f32 1.5, %v116_v35 }
  0xc2   :  { %v118_v37 = vmul.f32 %v167_v32, %v117_v36 }
  0xc4   :  { %v122_v39 = vsel %vm121_vm6, %v167_v32, %v118_v37 }
  0xc5   :  { %v123_v40 = vmul.f32 %v122_v39, %v102_v21 }
  0xc7   :  { %v128_v42 = vmul.f32 %v162_v38, %v123_v40 }
  0xc9   :  { %v133_v43 = vadd.f32 %v163_v41, %v128_v42 }
  0xcb   :  { %134 = vst.msk [vmem:[#allocation7] sm:$0x3] %vm86_vm2, %v133_v43 }
  0xcc   :  { %145 = dma.vmem_to_hbm [thread:$0]  %s141_s9, 32, %s143_s12, [#allocation4]  }
  0xcd   :  { %244 = dma.done.wait [#allocation4], 32  }
  0xce   :  { %245 = vsyncadd [#allocation4], 4294967264 }
  0xcf   :  { %150 = vsyncpa [#allocation3], 1 }
  0xd0   :  { %151 = vsyncpa [#allocation6], 1 }
  0xd1   :  { %152 = vsyncpa [#allocation4], 1 }

</bundles_post_ra>
